<compile_context>
chip_gen: v5e
topology: v5e:2x2
jax: 0.10.0
libtpu: 0.0.40
codegen_flags: <defaults>
</compile_context>

<pallas_src>
import jax
import jax.numpy as jnp
from jax.experimental import pallas as pl
from jax.experimental.pallas import tpu as pltpu


def _round_up(x, m):
    return ((x + m - 1) // m) * m


def _tensorcores_per_chip():
    """Best-effort count of TensorCores sharing one device (megacore / v7x)."""
    try:
        kind = jax.devices()[0].device_kind.lower()
    except Exception:
        return 1
    return 2 if any(t in kind for t in ("v4", "v5p", "v7")) else 1


def _critic_kernel(s_ref, a_ref, w1_ref, b1_ref, w2_ref, b2_ref,
                   w3_ref, b3_ref, o_ref):
    # linear1 (fused): concat state/action along lanes in VMEM, one MXU pass
    # against the combined bf16 weight.  Accumulation stays f32.
    x = jnp.concatenate([s_ref[...], a_ref[...]], axis=1).astype(jnp.bfloat16)
    h1 = jnp.dot(x, w1_ref[...], preferred_element_type=jnp.float32)
    h1 = jnp.maximum(h1 + b1_ref[...], 0.0)            # f32 epilogue (v5e-safe)

    # linear2 + relu -> [TB, 128]
    h2 = jnp.dot(h1.astype(jnp.bfloat16), w2_ref[...],
                 preferred_element_type=jnp.float32)
    h2 = jnp.maximum(h2 + b2_ref[...], 0.0)

    # linear3: [TB,128] x [128,1].  An N=1 MXU matmul wastes a systolic pass;
    # do a VPU broadcast-multiply + lane reduce, and store lane-dense [1, TB].
    q = jnp.sum(h2 * w3_ref[...], axis=-1)              # [TB]
    o_ref[...] = (q[None, :] + b3_ref[...]).astype(o_ref.dtype)


def critic_forward(state, action, params, *, block_batch=1024):
    """state: [B, state_dim], action: [B, action_dim] -> [B, 1] float32."""
    w1, b1, w2, b2, w3_row, b3 = params
    B, state_dim = state.shape
    action_dim = action.shape[1]

    # Pre-cast the big weights to bf16 once (MXU-native); biases / w3 stay f32.
    w1_bf = w1.astype(jnp.bfloat16)
    w2_bf = w2.astype(jnp.bfloat16)

    # Batch tile: multiple of 8 sublanes, capped at block_batch.  On chips
    # with 2 TensorCores per device make sure the grid has >= 2 steps so the
    # "parallel" axis actually shards the batch across cores.
    tb_cap = block_batch
    if _tensorcores_per_chip() > 1:
        tb_cap = min(tb_cap, max(256, _round_up(pl.cdiv(B, 2), 8)))
    tb = min(tb_cap, _round_up(B, 8))
    num_tiles = pl.cdiv(B, tb)

    act_spec = lambda d: pl.BlockSpec((tb, d), lambda i: (i, 0))
    # Weights/biases: full-extent block, same index every step -> VMEM-resident.
    res_spec = lambda arr: pl.BlockSpec(arr.shape, lambda i: (0,) * arr.ndim)

    out = pl.pallas_call(
        _critic_kernel,
        # Lane-dense output: one [1, tb] row per grid step.
        out_shape=jax.ShapeDtypeStruct((num_tiles, tb), jnp.float32),
        grid=(num_tiles,),
        in_specs=[
            act_spec(state_dim),
            act_spec(action_dim),
            res_spec(w1_bf), res_spec(b1),
            res_spec(w2_bf), res_spec(b2),
            res_spec(w3_row), res_spec(b3),
        ],
        out_specs=pl.BlockSpec((1, tb), lambda i: (i, 0)),
        compiler_params=pltpu.CompilerParams(
            # Batch tiles are independent -> megacore-shardable.
            dimension_semantics=("parallel",),
        ),
    )(state, action, w1_bf, b1, w2_bf, b2, w3_row, b3)

    # Undo the lane-dense packing; drop padded rows of the last tile.
    return out.reshape(num_tiles * tb, 1)[:B]


def init_params(key, state_dim, action_dim):
    """Deterministic init matching torch.nn.Linear's U(-1/sqrt(fan_in), ...).

    Layout: w1 combined [state_dim+action_dim, 256], biases as [1, out],
    w3 as a row [1, 128].
    """
    def linear(k, fan_in, fan_out):
        kw, kb = jax.random.split(k)
        bound = 1.0 / jnp.sqrt(float(fan_in))
        w = jax.random.uniform(kw, (fan_in, fan_out), jnp.float32, -bound, bound)
        b = jax.random.uniform(kb, (1, fan_out), jnp.float32, -bound, bound)
        return w, b

    k1, k2, k3 = jax.random.split(key, 3)
    w1, b1 = linear(k1, state_dim + action_dim, 256)
    w2, b2 = linear(k2, 256, 128)
    w3, b3 = linear(k3, 128, 1)
    return (w1, b1, w2, b2, w3.T, b3)


def critic_ref(state, action, params):
    """Pure-JAX reference of the PyTorch forward (f32 everywhere)."""
    w1, b1, w2, b2, w3_row, b3 = params
    x = jnp.concatenate([state, action], axis=1)
    x = jnp.maximum(x @ w1 + b1, 0.0)
    x = jnp.maximum(x @ w2 + b2, 0.0)
    return x @ w3_row.T + b3


if __name__ == "__main__":
    state_dim, action_dim = 16, 8
    key = jax.random.PRNGKey(0)
    kp, ks, ka = jax.random.split(key, 3)
    params = init_params(kp, state_dim, action_dim)

    # Test 1: small batch (single tile).
    batch = 8
    state = jax.random.normal(ks, (batch, state_dim), jnp.float32)
    action = jax.random.normal(ka, (batch, action_dim), jnp.float32)
    out = jax.block_until_ready(critic_forward(state, action, params))
    ref = critic_ref(state, action, params)
    assert out.shape == (batch, 1), out.shape
    # bf16 MXU operands with f32 accumulation -> loosened tolerance.
    assert jnp.allclose(out, ref, atol=5e-2, rtol=5e-2), (out, ref)

    # Test 2: batch not a multiple of the tile -> multi-step grid + padded
    # last tile (verifies the padded rows are dropped correctly).
    batch2 = 300
    state2 = jax.random.normal(ks, (batch2, state_dim), jnp.float32)
    action2 = jax.random.normal(ka, (batch2, action_dim), jnp.float32)
    out2 = jax.block_until_ready(
        critic_forward(state2, action2, params, block_batch=128))
    ref2 = critic_ref(state2, action2, params)
    assert out2.shape == (batch2, 1), out2.shape
    assert jnp.allclose(out2, ref2, atol=5e-2, rtol=5e-2)

    print("KERNEL_OK")
</pallas_src>

<mosaic_0001>
module attributes {stable_mosaic.version = 11 : i64} {
  func.func @_critic_kernel(%arg0: i32, %arg1: memref<8x16xf32, #tpu.memory_space<vmem>>, %arg2: memref<8x8xf32, #tpu.memory_space<vmem>>, %arg3: memref<24x256xbf16, #tpu.memory_space<vmem>>, %arg4: memref<1x256xf32, #tpu.memory_space<vmem>>, %arg5: memref<256x128xbf16, #tpu.memory_space<vmem>>, %arg6: memref<1x128xf32, #tpu.memory_space<vmem>>, %arg7: memref<1x128xf32, #tpu.memory_space<vmem>>, %arg8: memref<1x1xf32, #tpu.memory_space<vmem>>, %arg9: memref<1x8xf32, #tpu.memory_space<vmem>>) attributes {dimension_semantics = [#tpu.dimension_semantics<parallel>], iteration_bounds = array<i64: 1>, scalar_prefetch = 0 : i64, scratch_operands = 0 : i64, tpu.core_type = #tpu.core_type<tc>, window_params = [{transform_indices = @transform_0, window_bounds = array<i64: 8, 16>}, {transform_indices = @transform_1, window_bounds = array<i64: 8, 8>}, {pipeline_mode = #tpu.pipeline_mode<synchronous>, transform_indices = @transform_2, window_bounds = array<i64: 24, 256>}, {pipeline_mode = #tpu.pipeline_mode<synchronous>, transform_indices = @transform_3, window_bounds = array<i64: 1, 256>}, {pipeline_mode = #tpu.pipeline_mode<synchronous>, transform_indices = @transform_4, window_bounds = array<i64: 256, 128>}, {pipeline_mode = #tpu.pipeline_mode<synchronous>, transform_indices = @transform_5, window_bounds = array<i64: 1, 128>}, {pipeline_mode = #tpu.pipeline_mode<synchronous>, transform_indices = @transform_6, window_bounds = array<i64: 1, 128>}, {pipeline_mode = #tpu.pipeline_mode<synchronous>, transform_indices = @transform_7, window_bounds = array<i64: 1, 1>}, {transform_indices = @transform_8, window_bounds = array<i64: 1, 8>}]} {
    %c0 = arith.constant 0 : index
    %c0_0 = arith.constant 0 : index
    %0 = vector.load %arg1[%c0, %c0_0] : memref<8x16xf32, #tpu.memory_space<vmem>>, vector<8x16xf32>
    %c0_1 = arith.constant 0 : index
    %c0_2 = arith.constant 0 : index
    %1 = vector.load %arg2[%c0_1, %c0_2] : memref<8x8xf32, #tpu.memory_space<vmem>>, vector<8x8xf32>
    %2 = tpu.concatenate %0, %1 in 1 : vector<8x16xf32>, vector<8x8xf32> -> vector<8x24xf32>
    %3 = arith.truncf %2 : vector<8x24xf32> to vector<8x24xbf16>
    %c0_3 = arith.constant 0 : index
    %c0_4 = arith.constant 0 : index
    %4 = vector.load %arg3[%c0_3, %c0_4] : memref<24x256xbf16, #tpu.memory_space<vmem>>, vector<24x256xbf16>
    %cst = arith.constant dense<0.000000e+00> : vector<8x256xf32>
    %5 = tpu.matmul %3, %4, %cst {dimension_numbers = #tpu.dot_dimension_numbers<[1], [0], [0], [1], [0, 0, 1, 1], [], []>} : vector<8x24xbf16>, vector<24x256xbf16>, vector<8x256xf32> -> vector<8x256xf32>
    %c0_5 = arith.constant 0 : index
    %c0_6 = arith.constant 0 : index
    %6 = vector.load %arg4[%c0_5, %c0_6] : memref<1x256xf32, #tpu.memory_space<vmem>>, vector<1x256xf32>
    %7 = vector.broadcast %6 : vector<1x256xf32> to vector<8x256xf32>
    %8 = arith.addf %5, %7 : vector<8x256xf32>
    %cst_7 = arith.constant 0.000000e+00 : f32
    %9 = vector.broadcast %cst_7 : f32 to vector<8x256xf32>
    %10 = arith.maximumf %8, %9 : vector<8x256xf32>
    %11 = arith.truncf %10 : vector<8x256xf32> to vector<8x256xbf16>
    %c0_8 = arith.constant 0 : index
    %c0_9 = arith.constant 0 : index
    %12 = vector.load %arg5[%c0_8, %c0_9] : memref<256x128xbf16, #tpu.memory_space<vmem>>, vector<256x128xbf16>
    %cst_10 = arith.constant dense<0.000000e+00> : vector<8x128xf32>
    %13 = tpu.matmul %11, %12, %cst_10 {dimension_numbers = #tpu.dot_dimension_numbers<[1], [0], [0], [1], [0, 0, 1, 1], [], []>} : vector<8x256xbf16>, vector<256x128xbf16>, vector<8x128xf32> -> vector<8x128xf32>
    %c0_11 = arith.constant 0 : index
    %c0_12 = arith.constant 0 : index
    %14 = vector.load %arg6[%c0_11, %c0_12] : memref<1x128xf32, #tpu.memory_space<vmem>>, vector<1x128xf32>
    %15 = vector.broadcast %14 : vector<1x128xf32> to vector<8x128xf32>
    %16 = arith.addf %13, %15 : vector<8x128xf32>
    %cst_13 = arith.constant 0.000000e+00 : f32
    %17 = vector.broadcast %cst_13 : f32 to vector<8x128xf32>
    %18 = arith.maximumf %16, %17 : vector<8x128xf32>
    %c0_14 = arith.constant 0 : index
    %c0_15 = arith.constant 0 : index
    %19 = vector.load %arg7[%c0_14, %c0_15] : memref<1x128xf32, #tpu.memory_space<vmem>>, vector<1x128xf32>
    %20 = vector.broadcast %19 : vector<1x128xf32> to vector<8x128xf32>
    %21 = arith.mulf %18, %20 : vector<8x128xf32>
    %cst_16 = arith.constant dense<0.000000e+00> : vector<8xf32>
    %22 = vector.multi_reduction <add>, %21, %cst_16 [1] : vector<8x128xf32> to vector<8xf32>
    %23 = vector.shape_cast %22 : vector<8xf32> to vector<1x8xf32>
    %c0_17 = arith.constant 0 : index
    %c0_18 = arith.constant 0 : index
    %24 = vector.load %arg8[%c0_17, %c0_18] : memref<1x1xf32, #tpu.memory_space<vmem>>, vector<1x1xf32>
    %25 = vector.broadcast %24 : vector<1x1xf32> to vector<1x8xf32>
    %26 = arith.addf %23, %25 : vector<1x8xf32>
    %c0_19 = arith.constant 0 : index
    %c0_20 = arith.constant 0 : index
    %27 = vector.load %arg9[%c0_19, %c0_20] : memref<1x8xf32, #tpu.memory_space<vmem>>, vector<1x8xf32>
    tpu.vector_store %arg9[%c0_19, %c0_20], %26 {strides = array<i32>} : memref<1x8xf32, #tpu.memory_space<vmem>>, vector<1x8xf32>,
    return
  }
  func.func @transform_0(%arg0: i32) -> (i32, i32) {
    %c0_i32 = arith.constant 0 : i32
    %c0_i32_0 = arith.constant 0 : i32
    return %arg0, %c0_i32 : i32, i32
  }
  func.func @transform_1(%arg0: i32) -> (i32, i32) {
    %c0_i32 = arith.constant 0 : i32
    %c0_i32_0 = arith.constant 0 : i32
    return %arg0, %c0_i32 : i32, i32
  }
  func.func @transform_2(%arg0: i32) -> (i32, i32) {
    %c0_i32 = arith.constant 0 : i32
    %c0_i32_0 = arith.constant 0 : i32
    %c0_i32_1 = arith.constant 0 : i32
    return %c0_i32, %c0_i32_0 : i32, i32
  }
  func.func @transform_3(%arg0: i32) -> (i32, i32) {
    %c0_i32 = arith.constant 0 : i32
    %c0_i32_0 = arith.constant 0 : i32
    %c0_i32_1 = arith.constant 0 : i32
    return %c0_i32, %c0_i32_0 : i32, i32
  }
  func.func @transform_4(%arg0: i32) -> (i32, i32) {
    %c0_i32 = arith.constant 0 : i32
    %c0_i32_0 = arith.constant 0 : i32
    %c0_i32_1 = arith.constant 0 : i32
    return %c0_i32, %c0_i32_0 : i32, i32
  }
  func.func @transform_5(%arg0: i32) -> (i32, i32) {
    %c0_i32 = arith.constant 0 : i32
    %c0_i32_0 = arith.constant 0 : i32
    %c0_i32_1 = arith.constant 0 : i32
    return %c0_i32, %c0_i32_0 : i32, i32
  }
  func.func @transform_6(%arg0: i32) -> (i32, i32) {
    %c0_i32 = arith.constant 0 : i32
    %c0_i32_0 = arith.constant 0 : i32
    %c0_i32_1 = arith.constant 0 : i32
    return %c0_i32, %c0_i32_0 : i32, i32
  }
  func.func @transform_7(%arg0: i32) -> (i32, i32) {
    %c0_i32 = arith.constant 0 : i32
    %c0_i32_0 = arith.constant 0 : i32
    %c0_i32_1 = arith.constant 0 : i32
    return %c0_i32, %c0_i32_0 : i32, i32
  }
  func.func @transform_8(%arg0: i32) -> (i32, i32) {
    %c0_i32 = arith.constant 0 : i32
    %c0_i32_0 = arith.constant 0 : i32
    return %arg0, %c0_i32 : i32, i32
  }
}

</mosaic_0001>

<bundles_post_ra>
// kernel: tpu_custom_call.1
= control target key start
LH: loop header
LB: loop body
LE: loop exit
PB: predicated region body
PF: predicated region fallthrough
CT: control target
= control target key end

     0   :  { %s683_s0 = inlined_call_operand.hbm [shape: f32[8,16], index: 0, kind: input, shape index: {}]   ;;  %s684_s1 = inlined_call_operand.hbm [shape: f32[8,8], index: 1, kind: input, shape index: {}]   ;;  %s685_s2 = inlined_call_operand.hbm [shape: bf16[24,256], index: 2, kind: input, shape index: {}]   ;;  %s686_s3 = inlined_call_operand.vmem [shape: f32[1,256], index: 3, kind: input, shape index: {}]   ;;  %s687_s4 = inlined_call_operand.hbm [shape: bf16[256,128], index: 4, kind: input, shape index: {}]   ;;  %s688_s5 = inlined_call_operand.vmem [shape: f32[1,128], index: 5, kind: input, shape index: {}]   ;;  %s689_s6 = inlined_call_operand.vmem [shape: f32[1,128], index: 6, kind: input, shape index: {}]   ;;  %s690_s7 = inlined_call_operand.<no memory space> [shape: f32[1,1], index: 7, kind: input, shape index: {}]   ;;  %s691_s8 = inlined_call_operand.hbm [shape: f32[1,8], index: 8, kind: output, shape index: {}]  }
   0x1   :  { %v13_v0 = vstv %s690_s7 }
   0x2   :  { %14 = vst [vmem:[#allocation2] sm:$0x1] %v13_v0 }
   0x3   :  { %15 = vsyncpa [#allocation4], 0 }
   0x4   :  { %16 = vsyncpa [#allocation7], 0 }
   0x5   :  { %17 = vsyncpa [#allocation10], 0  ;;  %s35_s9 = sshll.u32 %s684_s1, 4  ;;  %s36_s9 = int_to_ptr.hbm [resolvable:$true] %s35_s9 }
   0x6   :  { %18 = vsyncpa [#allocation5], 0  ;;  %s600_s10 = smov [#allocation6]   ;;  %s24_s14 = sshll.u32 %s683_s0, 4  ;;  %s25_s14 = int_to_ptr.hbm [resolvable:$true] %s24_s14 }
   0x7   :  { %s37_s11 = sshll.u32 %s600_s10, 4  ;;  %s601_s7 = smov [#allocation3]   ;;  %s38_s11 = int_to_ptr.vmem [resolvable:$true] %s37_s11 }
   0x8   :  { %40 = dma.hbm_to_vmem [thread:$0]  %s36_s9, 128, %s38_s11, [#allocation7]  }
   0x9   :  { %s26_s15 = sshll.u32 %s601_s7, 4  ;;  %s45_s18 = sshll.u32 %s685_s2, 4  ;;  %s27_s15 = int_to_ptr.vmem [resolvable:$true] %s26_s15  ;;  %s46_s18 = int_to_ptr.hbm [resolvable:$true] %s45_s18 }
   0xa   :  { %29 = dma.hbm_to_vmem [thread:$0]  %s25_s14, 128, %s27_s15, [#allocation4]  }
   0xb   :  { %s602_s1 = smov [#allocation8]   ;;  %s60_s22 = sshll.u32 %s687_s4, 4  ;;  %s61_s22 = int_to_ptr.hbm [resolvable:$true] %s60_s22 }
   0xc   :  { %s47_s19 = sshll.u32 %s602_s1, 4  ;;  %s603_s23 = smov 128   ;;  %s48_s19 = int_to_ptr.vmem [resolvable:$true] %s47_s19 }
   0xd   :  { %s604_s0 = smov 8   ;;  %s605_s24 = smov [#allocation9]  }
   0xe   :  { %53 = dma.hbm_to_vmem [thread:$0]  %s46_s18, 384, %s48_s19, [#allocation7], %s603_s23, %s603_s23, %s604_s0  }
   0xf   :  { %s62_s25 = sshll.u32 %s605_s24, 4  ;;  %s606_s26 = smov 64   ;;  %s63_s25 = int_to_ptr.vmem [resolvable:$true] %s62_s25 }
  0x10   :  { %s607_s27 = smov 4  }
  0x11   :  { %68 = dma.hbm_to_vmem [thread:$0]  %s61_s22, 2048, %s63_s25, [#allocation10], %s606_s26, %s606_s26, %s607_s27  }
  0x12   :  { %592 = dma.done.wait [#allocation4], 128  }
  0x13   :  { %593 = vsyncadd [#allocation4], 4294967168 }
  0x14   :  { %594 = dma.done.wait [#allocation7], 512  }
  0x15   :  { %595 = vsyncadd [#allocation7], 4294966784 }
  0x16   :  { %596 = dma.done.wait [#allocation10], 2048  }
  0x17   :  { %597 = vsyncadd [#allocation10], 4294965248  ;;  %v93_v1 = vld [vmem:[#allocation6] sm:$0xff]  ;;  %v103_v2 = vld [vmem:[#allocation8 + $0x10] sm:$0xff]  ;;  %s608_s2 = smov 16   ;;  %vm129_vm0 = vcmask 1043456   ;;  %v341_v61 = vlaneseq }
  0x18   :  { %95 = vrot.lane.b32.xlu0 %v93_v1, %s608_s2  ;;  %v117_v3 = vunpack.c.l.b16 %v103_v2  ;;  %v118_v4 = vunpack.c.h.b16 %v103_v2  ;;  %v368_v9 = vld [vmem:[#allocation8] sm:$0xf]  ;;  %v441_v10 = vld [vmem:[#allocation8 + $0x4] sm:$0xf0]  ;;  %v440_v11 = vld [vmem:[#allocation8 + $0x4] sm:$0xf] }
  0x19   :  { %v369_v12 = vor.u32 %v441_v10, %v368_v9  ;;  %v370_v13 = vld [vmem:[#allocation8 + $0x8] sm:$0xf0]  ;;  %v449_v15 = vld [vmem:[#allocation9 + $0x38] sm:$0xff]  ;;  %v447_v19 = vld [vmem:[#allocation9 + $0x28] sm:$0xff]  ;;  %vm98_vm1 = vcmask 130048   ;;  %vm125_vm2 = vcmask 195584  }
  0x1a   :  { %v121_v5 = vpack.c.b16 %v117_v3, %v117_v3  ;;  %v122_v6 = vpack.c.b16 %v118_v4, %v118_v4  ;;  %v373_v14 = vor.u32 %v440_v11, %v370_v13  ;;  %v457_v16 = vld [vmem:[#allocation9 + $0x78] sm:$0xff]  ;;  %298 = vmatpush.bf16.msra.mxu2 %v449_v15  ;;  %v448_v17 = vld [vmem:[#allocation9 + $0x30] sm:$0xff]  ;;  %v455_v20 = vld [vmem:[#allocation9 + $0x68] sm:$0xff]  ;;  %v609_v49 = vmov 0   ;;  %s610_s10 = smov [#allocation11]   ;;  %s354_s13 = sshll.u32 %s691_s8, 4  ;;  %s355_s13 = int_to_ptr.hbm [resolvable:$true] %s354_s13 }
  0x1b   :  { %311 = vmatpush.bf16.msra.mxu3 %v457_v16  ;;  %v456_v18 = vld [vmem:[#allocation9 + $0x70] sm:$0xff]  ;;  %v446_v21 = vld [vmem:[#allocation9 + $0x20] sm:$0xff]  ;;  %v445_v23 = vld [vmem:[#allocation9 + $0x18] sm:$0xff]  ;;  %469 = vset.pattern.permute.xlu0 %v609_v49  ;;  %v342_v63 = vand.u32 127, %v341_v61  ;;  %vm345_vm3 = vcmask 57344  }
  0x1c   :  { %v131_v7 = vsel %vm129_vm0, %v121_v5, 0  ;;  %v134_v8 = vsel %vm129_vm0, %v122_v6, 0  ;;  %v454_v22 = vld [vmem:[#allocation9 + $0x60] sm:$0xff]  ;;  %v453_v24 = vld [vmem:[#allocation9 + $0x58] sm:$0xff]  ;;  %v444_v25 = vld [vmem:[#allocation9 + $0x10] sm:$0xff] }
  0x1d   :  { %142 = vmatpush.bf16.msra.mxu0 %v131_v7  ;;  %155 = vmatpush.bf16.msra.mxu1 %v134_v8  ;;  %v452_v26 = vld [vmem:[#allocation9 + $0x50] sm:$0xff]  ;;  %v92_v27 = vld [vmem:[#allocation3] sm:$0xff]  ;;  %v443_v31 = vld [vmem:[#allocation9 + $0x8] sm:$0xff] }
  0x1e   :  { %299 = vmatpush.bf16.msra.mxu2 %v448_v17  ;;  %v451_v32 = vld [vmem:[#allocation9 + $0x48] sm:$0xff]  ;;  %v442_v33 = vld [vmem:[#allocation9] sm:$0xff]  ;;  %v104_v35 = vld [vmem:[%s686_s3] sm:$0x3] }
  0x1f   :  { %312 = vmatpush.bf16.msra.mxu3 %v456_v18  ;;  %v450_v34 = vld [vmem:[#allocation9 + $0x40] sm:$0xff]  ;;  %v106_v36 = vperm.slane %v104_v35, 0  ;;  %v107_v37 = vperm.slane %v104_v35, 1  ;;  %v332_v48 = vld [vmem:[#allocation2] sm:$0x1] }
  0x20   :  { %335 = vperm.xlu0 %469, %v332_v48   ;;  %v470_v50 = vld [vmem:[%s688_s5] ss:$0 sm:$0xff]  ;;  %s352_s5 = sshll.u32 %s610_s10, 4  ;;  %s353_s5 = int_to_ptr.vmem [resolvable:$true] %s352_s5 }
  0x21   :  { %143 = vmatpush.bf16.msra.mxu0 %v369_v12  ;;  %156 = vmatpush.bf16.msra.mxu1 %v373_v14  ;;  %v471_v55 = vld [vmem:[%s689_s6] ss:$0 sm:$0xff] }
  0x22   :  { %300 = vmatpush.bf16.msra.mxu2 %v447_v19 }
  0x23   :  { %313 = vmatpush.bf16.msra.mxu3 %v455_v20 }
  0x26   :  { %301 = vmatpush.bf16.msra.mxu2 %v446_v21 }
  0x27   :  { %314 = vmatpush.bf16.msra.mxu3 %v454_v22 }
  0x2a   :  { %302 = vmatpush.bf16.msra.mxu2 %v445_v23 }
  0x2b   :  { %315 = vmatpush.bf16.msra.mxu3 %v453_v24 }
  0x2e   :  { %303 = vmatpush.bf16.msra.mxu2 %v444_v25 }
  0x2f   :  { %316 = vmatpush.bf16.msra.mxu3 %v452_v26 }
  0x32   :  { %304 = vmatpush.bf16.msra.mxu2 %v443_v31 }
  0x33   :  { %317 = vmatpush.bf16.msra.mxu3 %v451_v32 }
  0x36   :  { %305 = vmatpush.bf16.msra.mxu2 %v442_v33 }
  0x37   :  { %318 = vmatpush.bf16.msra.mxu3 %v450_v34 }
  0x8a   :  { %v96_v28 = vpop.permute.xlu0 %95 }
  0x8b   :  { %v99_v29 = vsel %vm98_vm1, %v92_v27, %v96_v28 }
  0x8c   :  { %v100_v30 = vpack.c.bf16 %v99_v29, %v99_v29 }
  0x8e   :  { %374 = vmatmul.msk.bf16.vlgmr.msra.gmra.mxu0 %vm125_vm2, %v100_v30  ;;  %375 = vmatmul.msk.bf16.vlgmr.msra.gmra.mxu1 %vm125_vm2, %v100_v30 }
  0x92   :  { %v336_v60 = vpop.permute.xlu0 %335 }
  0x93   :  { %v338_v62 = vperm.slane %v336_v60, 0 }
 0x10b   :  { %v145_v38 = vpop.f32.mrf.mxu0  ;;  %v158_v39 = vpop.f32.mrf.mxu1 }
 0x10c   :  { %v146_v40 = vadd.f32 %v145_v38, %v106_v36  ;;  %v159_v41 = vadd.f32 %v158_v39, %v107_v37 }
 0x10e   :  { %v162_v42 = vmax.f32 %v146_v40, 0.0  ;;  %v163_v43 = vmax.f32 %v159_v41, 0.0 }
 0x110   :  { %v164_v44 = vpack.c.bf16 %v162_v42, %v162_v42  ;;  %v165_v45 = vpack.c.bf16 %v163_v43, %v163_v43 }
 0x112   :  { %306 = vmatmul.bf16.vlgmr.msra.gmra.mxu2 %v164_v44  ;;  %319 = vmatmul.bf16.vlgmr.msra.gmra.mxu3 %v165_v45 }
 0x113   :  { %v147_v46 = vpop.f32.mrf.mxu0  ;;  %v160_v47 = vpop.f32.mrf.mxu1 }
 0x195   :  { %v307_v51 = vpop.f32.mrf.mxu2  ;;  %v320_v52 = vpop.f32.mrf.mxu3 }
 0x196   :  { %v308_v53 = vadd.f32 %v470_v50, %v307_v51 }
 0x198   :  { %v321_v54 = vadd.f32 %v320_v52, %v308_v53 }
 0x19a   :  { %v324_v56 = vmax.f32 %v321_v54, 0.0 }
 0x19c   :  { %v329_v57 = vmul.f32 %v471_v55, %v324_v56 }
 0x19d   :  { %v309_v58 = vpop.f32.mrf.mxu2  ;;  %v322_v59 = vpop.f32.mrf.mxu3 }
 0x19e   :  { %330 = vadd.xlane.f32.xlu1 %v329_v57 }
 0x211   :  { %v331_v0 = vpop.xlane.xlu1 %330 }
 0x212   :  { %v339_v1 = vadd.f32 %v338_v62, %v331_v0 }
 0x214   :  { %v343_v2 = vperm.slane %v339_v1, %v342_v63 }
 0x216   :  { %346 = vst.msk [vmem:[#allocation11] sm:$0x1] %vm345_vm3, %v343_v2 }
 0x217   :  { %357 = dma.vmem_to_hbm [thread:$0]  %s353_s5, 16, %s355_s13, [#allocation5]  }
 0x218   :  { %598 = dma.done.wait [#allocation5], 16  }
 0x219   :  { %599 = vsyncadd [#allocation5], 4294967280 }
 0x21a   :  { %362 = vsyncpa [#allocation4], 1 }
 0x21b   :  { %363 = vsyncpa [#allocation7], 1 }
 0x21c   :  { %364 = vsyncpa [#allocation10], 1 }
 0x21d   :  { %365 = vsyncpa [#allocation5], 1 }

</bundles_post_ra>
